<compile_context>
chip_gen: v7x
topology: tpu7x:2x2x1
jax: 0.10.0
libtpu: 0.0.40
codegen_flags: <defaults>
</compile_context>

<pallas_src>
import functools

import jax
import jax.numpy as jnp
from jax import lax
from jax.experimental import pallas as pl
from jax.experimental.pallas import tpu as pltpu


def _self_attention_kernel(x_ref, wqkv_ref, out_ref, attn_ref,
                           q_cache, k_cache, v_cache,
                           *, hidden_dim, q_tile, inv_scale):
    """Grid = (batch, num_q_tiles).

    x_ref    : (1, S, H)  full sequence for this batch (block reused across q tiles)
    wqkv_ref : (H, 3H)    pre-transposed fused [Wq^T | Wk^T | Wv^T]
    out_ref  : (1, tq, H) attention-output tile
    attn_ref : (1, tq, S) attention-probability tile
    q/k/v_cache : (S, H)  VMEM scratch, filled once per batch at q-tile 0
    """
    qi = pl.program_id(1)
    H = hidden_dim

    # ---- Fused QKV projection, once per batch (q-tile axis is 'arbitrary'). ----
    @pl.when(qi == 0)
    def _():
        x = x_ref[0]                                    # (S, H)  native dtype
        w = wqkv_ref[...]                               # (H, 3H) native dtype
        qkv = jnp.dot(x, w, preferred_element_type=jnp.float32)   # (S, 3H) f32
        # Fold 1/sqrt(H) into Q here (O(S*H) once) instead of scaling S*S scores.
        q_cache[...] = (qkv[:, :H] * inv_scale).astype(q_cache.dtype)
        k_cache[...] = qkv[:, H:2 * H].astype(k_cache.dtype)
        v_cache[...] = qkv[:, 2 * H:].astype(v_cache.dtype)

    # ---- Scores for this query tile against all keys (no transpose of K). ----
    row0 = pl.multiple_of(qi * q_tile, q_tile)
    q = q_cache[pl.ds(row0, q_tile), :]                 # (tq, H) compute dtype (pre-scaled)
    k = k_cache[...]                                    # (S, H)
    v = v_cache[...]                                    # (S, H)

    scores = lax.dot_general(
        q, k,
        dimension_numbers=(((1,), (1,)), ((), ())),     # contract last dims
        preferred_element_type=jnp.float32)             # (tq, S) f32

    # ---- Numerically stable softmax, f32; reciprocal on the EUP. ----
    m = jnp.max(scores, axis=-1, keepdims=True)
    e = jnp.exp(scores - m)
    denom = jnp.sum(e, axis=-1, keepdims=True)          # (tq, 1)
    r = pl.reciprocal(denom, approx=True)
    r = r * (2.0 - denom * r)   # one Newton step on a tiny column: ~free, restores f32 accuracy
    attn = e * r                                        # (tq, S) f32

    # Dropout(0.1): eval-mode identity.
    # TODO(synk): training-mode dropout not implemented.

    # ---- Weighted sum; MXU consumes attn in the compute dtype. ----
    out = jnp.dot(attn.astype(v.dtype), v,
                  preferred_element_type=jnp.float32)   # (tq, H) f32

    out_ref[0] = out.astype(out_ref.dtype)
    attn_ref[0] = attn.astype(attn_ref.dtype)


def _pick_q_tile(seq_len):
    if seq_len <= 256:
        return seq_len
    for t in (256, 128, 64, 32, 16, 8):
        if seq_len % t == 0:
            return t
    return seq_len


def self_attention(x, wq, wk, wv):
    """x: (B, S, H); wq/wk/wv: (H, H) in nn.Linear (out_features, in_features) layout."""
    B, S, H = x.shape
    compute_dtype = x.dtype
    inv_scale = float(1.0 / jnp.sqrt(jnp.float32(H)))

    # Pre-transpose once and fuse the three projection weights: y = x @ w_qkv.
    w_qkv = jnp.concatenate([wq.T, wk.T, wv.T], axis=1).astype(compute_dtype)

    q_tile = _pick_q_tile(S)
    num_q_tiles = int(pl.cdiv(S, q_tile))

    kernel = functools.partial(
        _self_attention_kernel,
        hidden_dim=H, q_tile=q_tile, inv_scale=inv_scale)

    out_shapes = (
        jax.ShapeDtypeStruct((B, S, H), x.dtype),   # attn_output
        jax.ShapeDtypeStruct((B, S, S), x.dtype),   # attn_weights (module returns it)
    )

    x_spec = pl.BlockSpec((1, S, H), lambda b, q: (b, 0, 0))    # same block across q tiles -> no re-DMA
    w_spec = pl.BlockSpec((H, 3 * H), lambda b, q: (0, 0))      # resident
    out_spec = pl.BlockSpec((1, q_tile, H), lambda b, q: (b, q, 0))
    attn_spec = pl.BlockSpec((1, q_tile, S), lambda b, q: (b, q, 0))

    # VMEM budget: double-buffered blocks + persistent Q/K/V cache (+ headroom),
    # capped at 64 MiB so it is valid on v5e/v6e (128 MiB) and v7x (64 MiB).
    itemsize = jnp.dtype(compute_dtype).itemsize
    block_bytes = (S * H + H * 3 * H + q_tile * H + q_tile * S) * itemsize
    scratch_bytes = 3 * S * H * itemsize
    vmem_limit = int(min(max(2 * (2 * block_bytes + scratch_bytes), 32 << 20), 64 << 20))

    return pl.pallas_call(
        kernel,
        out_shape=out_shapes,
        grid_spec=pltpu.PrefetchScalarGridSpec(
            num_scalar_prefetch=0,
            grid=(B, num_q_tiles),
            in_specs=[x_spec, w_spec],
            out_specs=[out_spec, attn_spec],
            scratch_shapes=[pltpu.VMEM((S, H), compute_dtype)] * 3,
        ),
        compiler_params=pltpu.CompilerParams(
            # Batch axis is megacore-parallel; the q-tile axis carries the
            # per-batch QKV cache dependency, so it must stay 'arbitrary'.
            dimension_semantics=("parallel", "arbitrary"),
            vmem_limit_bytes=vmem_limit,
        ),
    )(x, w_qkv)


def _reference(x, wq, wk, wv):
    H = x.shape[-1]
    q = jnp.einsum("bsh,oh->bso", x, wq)
    k = jnp.einsum("bsh,oh->bso", x, wk)
    v = jnp.einsum("bsh,oh->bso", x, wv)
    scores = jnp.einsum("bqh,bkh->bqk", q, k) / jnp.sqrt(jnp.float32(H))
    attn = jax.nn.softmax(scores, axis=-1)
    out = jnp.einsum("bqk,bkh->bqh", attn, v)
    return out, attn


if __name__ == "__main__":
    key = jax.random.PRNGKey(0)
    B, S, H = 2, 8, 32

    kx, kq, kk, kv = jax.random.split(key, 4)
    x = jax.random.normal(kx, (B, S, H), dtype=jnp.float32)

    # nn.Linear default init (uniform in [-1/sqrt(H), 1/sqrt(H)]), deterministic.
    bound = 1.0 / float(jnp.sqrt(jnp.float32(H)))
    wq = jax.random.uniform(kq, (H, H), jnp.float32, -bound, bound)
    wk = jax.random.uniform(kk, (H, H), jnp.float32, -bound, bound)
    wv = jax.random.uniform(kv, (H, H), jnp.float32, -bound, bound)

    attn_output, attn_weights = self_attention(x, wq, wk, wv)
    jax.block_until_ready((attn_output, attn_weights))

    ref_out, ref_attn = _reference(x, wq, wk, wv)
    assert jnp.allclose(attn_output, ref_out, atol=1e-4, rtol=1e-4), \
        float(jnp.max(jnp.abs(attn_output - ref_out)))
    assert jnp.allclose(attn_weights, ref_attn, atol=1e-4, rtol=1e-4), \
        float(jnp.max(jnp.abs(attn_weights - ref_attn)))

    print("KERNEL_OK")
</pallas_src>

<mosaic_0001>
module attributes {stable_mosaic.version = 11 : i64} {
  func.func @_self_attention_kernel(%arg0: i32, %arg1: i32, %arg2: memref<1x8x32xf32, #tpu.memory_space<vmem>>, %arg3: memref<32x96xf32, #tpu.memory_space<vmem>>, %arg4: memref<1x8x32xf32, #tpu.memory_space<vmem>>, %arg5: memref<1x8x8xf32, #tpu.memory_space<vmem>>, %arg6: memref<8x32xf32, #tpu.memory_space<vmem>>, %arg7: memref<8x32xf32, #tpu.memory_space<vmem>>, %arg8: memref<8x32xf32, #tpu.memory_space<vmem>>) attributes {dimension_semantics = [#tpu.dimension_semantics<parallel>, #tpu.dimension_semantics<arbitrary>], iteration_bounds = array<i64: 2, 1>, scalar_prefetch = 0 : i64, scratch_operands = 3 : i64, tpu.core_type = #tpu.core_type<tc>, window_params = [{transform_indices = @transform_0, window_bounds = array<i64: 1, 8, 32>}, {pipeline_mode = #tpu.pipeline_mode<synchronous>, transform_indices = @transform_1, window_bounds = array<i64: 32, 96>}, {transform_indices = @transform_2, window_bounds = array<i64: 1, 8, 32>}, {transform_indices = @transform_3, window_bounds = array<i64: 1, 8, 8>}]} {
    %c0_i32 = arith.constant 0 : i32
    %0 = arith.cmpi eq, %arg1, %c0_i32 : i32
    %1 = arith.extui %0 : i1 to i32
    %c0_i32_0 = arith.constant 0 : i32
    %2 = arith.cmpi ne, %1, %c0_i32_0 : i32
    scf.if %2 {
      %c0_15 = arith.constant 0 : index
      %c0_16 = arith.constant 0 : index
      %c0_17 = arith.constant 0 : index
      %31 = vector.load %arg2[%c0_15, %c0_16, %c0_17] : memref<1x8x32xf32, #tpu.memory_space<vmem>>, vector<1x8x32xf32>
      %32 = vector.shape_cast %31 : vector<1x8x32xf32> to vector<8x32xf32>
      %c0_18 = arith.constant 0 : index
      %c0_19 = arith.constant 0 : index
      %33 = vector.load %arg3[%c0_18, %c0_19] : memref<32x96xf32, #tpu.memory_space<vmem>>, vector<32x96xf32>
      %cst_20 = arith.constant dense<0.000000e+00> : vector<8x96xf32>
      %34 = tpu.matmul %32, %33, %cst_20 {dimension_numbers = #tpu.dot_dimension_numbers<[1], [0], [0], [1], [0, 0, 1, 1], [], []>} : vector<8x32xf32>, vector<32x96xf32>, vector<8x96xf32> -> vector<8x96xf32>
      %35 = vector.extract_strided_slice %34 {offsets = [0, 0], sizes = [8, 32], strides = [1, 1]} : vector<8x96xf32> to vector<8x32xf32>
      %cst_21 = arith.constant 0.176776692 : f32
      %36 = vector.broadcast %cst_21 : f32 to vector<8x32xf32>
      %37 = arith.mulf %35, %36 : vector<8x32xf32>
      %c0_22 = arith.constant 0 : index
      %c0_23 = arith.constant 0 : index
      %38 = vector.load %arg6[%c0_22, %c0_23] : memref<8x32xf32, #tpu.memory_space<vmem>>, vector<8x32xf32>
      tpu.vector_store %arg6[%c0_22, %c0_23], %37 {strides = array<i32>} : memref<8x32xf32, #tpu.memory_space<vmem>>, vector<8x32xf32>,
      %39 = vector.extract_strided_slice %34 {offsets = [0, 32], sizes = [8, 32], strides = [1, 1]} : vector<8x96xf32> to vector<8x32xf32>
      %c0_24 = arith.constant 0 : index
      %c0_25 = arith.constant 0 : index
      %40 = vector.load %arg7[%c0_24, %c0_25] : memref<8x32xf32, #tpu.memory_space<vmem>>, vector<8x32xf32>
      tpu.vector_store %arg7[%c0_24, %c0_25], %39 {strides = array<i32>} : memref<8x32xf32, #tpu.memory_space<vmem>>, vector<8x32xf32>,
      %41 = vector.extract_strided_slice %34 {offsets = [0, 64], sizes = [8, 32], strides = [1, 1]} : vector<8x96xf32> to vector<8x32xf32>
      %c0_26 = arith.constant 0 : index
      %c0_27 = arith.constant 0 : index
      %42 = vector.load %arg8[%c0_26, %c0_27] : memref<8x32xf32, #tpu.memory_space<vmem>>, vector<8x32xf32>
      tpu.vector_store %arg8[%c0_26, %c0_27], %41 {strides = array<i32>} : memref<8x32xf32, #tpu.memory_space<vmem>>, vector<8x32xf32>,
    } else {
    }
    %c8_i32 = arith.constant 8 : i32
    %3 = arith.muli %arg1, %c8_i32 : i32
    %4 = tpu.assume_multiple %3, 8 : i32
    %5 = arith.index_cast %4 : i32 to index
    %c0 = arith.constant 0 : index
    %6 = vector.load %arg6[%5, %c0] : memref<8x32xf32, #tpu.memory_space<vmem>>, vector<8x32xf32>
    %c0_1 = arith.constant 0 : index
    %c0_2 = arith.constant 0 : index
    %7 = vector.load %arg7[%c0_1, %c0_2] : memref<8x32xf32, #tpu.memory_space<vmem>>, vector<8x32xf32>
    %c0_3 = arith.constant 0 : index
    %c0_4 = arith.constant 0 : index
    %8 = vector.load %arg8[%c0_3, %c0_4] : memref<8x32xf32, #tpu.memory_space<vmem>>, vector<8x32xf32>
    %cst = arith.constant dense<0.000000e+00> : vector<8x8xf32>
    %9 = tpu.matmul %6, %7, %cst {dimension_numbers = #tpu.dot_dimension_numbers<[1], [1], [0], [0], [0, 0, 1, 0], [], []>} : vector<8x32xf32>, vector<8x32xf32>, vector<8x8xf32> -> vector<8x8xf32>
    %cst_5 = arith.constant dense<0xFF800000> : vector<8xf32>
    %10 = vector.multi_reduction <maximumf>, %9, %cst_5 [1] : vector<8x8xf32> to vector<8xf32>
    %11 = vector.shape_cast %10 : vector<8xf32> to vector<8x1xf32>
    %12 = vector.broadcast %11 : vector<8x1xf32> to vector<8x8xf32>
    %13 = arith.subf %9, %12 : vector<8x8xf32>
    %14 = math.exp %13 : vector<8x8xf32>
    %cst_6 = arith.constant dense<0.000000e+00> : vector<8xf32>
    %15 = vector.multi_reduction <add>, %14, %cst_6 [1] : vector<8x8xf32> to vector<8xf32>
    %16 = vector.shape_cast %15 : vector<8xf32> to vector<8x1xf32>
    %17 = tpu.reciprocal %16 {approx = true} : vector<8x1xf32> -> vector<8x1xf32>
    %18 = arith.mulf %16, %17 : vector<8x1xf32>
    %cst_7 = arith.constant 2.000000e+00 : f32
    %19 = vector.broadcast %cst_7 : f32 to vector<8x1xf32>
    %20 = arith.subf %19, %18 : vector<8x1xf32>
    %21 = arith.mulf %17, %20 : vector<8x1xf32>
    %22 = vector.broadcast %21 : vector<8x1xf32> to vector<8x8xf32>
    %23 = arith.mulf %14, %22 : vector<8x8xf32>
    %cst_8 = arith.constant dense<0.000000e+00> : vector<8x32xf32>
    %24 = tpu.matmul %23, %8, %cst_8 {dimension_numbers = #tpu.dot_dimension_numbers<[1], [0], [0], [1], [0, 0, 1, 1], [], []>} : vector<8x8xf32>, vector<8x32xf32>, vector<8x32xf32> -> vector<8x32xf32>
    %c0_9 = arith.constant 0 : index
    %c0_10 = arith.constant 0 : index
    %c0_11 = arith.constant 0 : index
    %25 = vector.load %arg4[%c0_9, %c0_10, %c0_11] : memref<1x8x32xf32, #tpu.memory_space<vmem>>, vector<1x8x32xf32>
    %26 = vector.shape_cast %25 : vector<1x8x32xf32> to vector<8x32xf32>
    %27 = vector.shape_cast %24 : vector<8x32xf32> to vector<1x8x32xf32>
    tpu.vector_store %arg4[%c0_9, %c0_10, %c0_11], %27 {strides = array<i32>} : memref<1x8x32xf32, #tpu.memory_space<vmem>>, vector<1x8x32xf32>,
    %c0_12 = arith.constant 0 : index
    %c0_13 = arith.constant 0 : index
    %c0_14 = arith.constant 0 : index
    %28 = vector.load %arg5[%c0_12, %c0_13, %c0_14] : memref<1x8x8xf32, #tpu.memory_space<vmem>>, vector<1x8x8xf32>
    %29 = vector.shape_cast %28 : vector<1x8x8xf32> to vector<8x8xf32>
    %30 = vector.shape_cast %23 : vector<8x8xf32> to vector<1x8x8xf32>
    tpu.vector_store %arg5[%c0_12, %c0_13, %c0_14], %30 {strides = array<i32>} : memref<1x8x8xf32, #tpu.memory_space<vmem>>, vector<1x8x8xf32>,
    return
  }
  func.func @transform_0(%arg0: i32, %arg1: i32) -> (i32, i32, i32) {
    %c0_i32 = arith.constant 0 : i32
    %c0_i32_0 = arith.constant 0 : i32
    %c0_i32_1 = arith.constant 0 : i32
    return %arg0, %c0_i32, %c0_i32_0 : i32, i32, i32
  }
  func.func @transform_1(%arg0: i32, %arg1: i32) -> (i32, i32) {
    %c0_i32 = arith.constant 0 : i32
    %c0_i32_0 = arith.constant 0 : i32
    %c0_i32_1 = arith.constant 0 : i32
    return %c0_i32, %c0_i32_0 : i32, i32
  }
  func.func @transform_2(%arg0: i32, %arg1: i32) -> (i32, i32, i32) {
    %c0_i32 = arith.constant 0 : i32
    %c0_i32_0 = arith.constant 0 : i32
    return %arg0, %arg1, %c0_i32 : i32, i32, i32
  }
  func.func @transform_3(%arg0: i32, %arg1: i32) -> (i32, i32, i32) {
    %c0_i32 = arith.constant 0 : i32
    %c0_i32_0 = arith.constant 0 : i32
    return %arg0, %arg1, %c0_i32 : i32, i32, i32
  }
}

</mosaic_0001>

<bundles_post_ra>
// kernel: tpu_custom_call.1
= control target key start
LH: loop header
LB: loop body
LE: loop exit
PB: predicated region body
PF: predicated region fallthrough
CT: control target
= control target key end

     0   :  { %9 = vsyncpa [#allocation6], 0  ;;  %s1268_s0 = inlined_call_operand.hbm [shape: f32[2,8,32], index: 0, kind: input, shape index: {}]   ;;  %s1269_s1 = inlined_call_operand.hbm [shape: f32[32,96], index: 1, kind: input, shape index: {}]   ;;  %s1270_s2 = inlined_call_operand.hbm [shape: f32[2,8,32], index: 2, kind: output, shape index: {0}]   ;;  %s1271_s3 = inlined_call_operand.hbm [shape: f32[2,8,8], index: 3, kind: output, shape index: {1}]  }
   0x1   :  { %11 = vsyncpa [#allocation6 + $0x1], 0 }
   0x2   :  { %12 = vsyncpa [#allocation9], 0 }
   0x3   :  { %13 = vsyncpa [#allocation7], 0 }
   0x4   :  { %15 = vsyncpa [#allocation7 + $0x1], 0 }
   0x5   :  { %16 = vsyncpa [#allocation12], 0 }
   0x6   :  { %18 = vsyncpa [#allocation12 + $0x1], 0  ;;  %s1008_s12 = smov 0   ;;  %s1010_s13 = smov 0  }
   0x7   :  { %s1012_s14 = smov 0   ;;  %s1014_s15 = smov 0  }
   0x8   :  { %s1016_s16 = smov 0   ;;  %s1018_s17 = smov 0  }
   0x9 LB: > { %s652_s18 = sadd.s32 4294967295, %s975_s17   ;;  %s653_s19 = sadd.s32 4294967294, %s975_s17   ;;  %s975_s17 = sphi %s1018_s17, %s24_s17   ;;  %s971_s16 = sphi %s1016_s16, %s1295_s16   ;;  %s967_s15 = sphi %s1014_s15, %s1294_s15   ;;  %s963_s14 = sphi %s1012_s14, %s1293_s14   ;;  %s959_s13 = sphi %s1010_s13, %s1292_s13   ;;  %s955_s12 = sphi %s1008_s12, %s1291_s12  }
   0xa   : > { %p56_p0 = scmp.ne.s32.totalorder %s959_s13, %s955_s12  ;;  %p1042_p1 = scmp.eq.s32.totalorder %s652_s18, 0 }
   0xb   : > { %p1046_p2 = scmp.eq.s32.totalorder %s652_s18, 1  ;;  %p109_p3 = scmp.eq.s32.totalorder %s653_s19, 1 }
   0xc   : > { %s1276_s20 = scalar_select %p1042_p1, 1, 0 }
   0xd   : > { %s1277_s21 = scalar_select %p1046_p2, 1, 0 }
   0xe   : > { %p1052_p4 = por %p1042_p1, %p56_p0  ;;  %p654_p5 = scmp.ge.s32.totalorder %s975_s17, 1 }
   0xf   : > { %p1057_p6 = por %p109_p3, %p56_p0  ;;  %p144_p7 = scmp.lt.s32.totalorder %s975_s17, 3 }
  0x10   : > { %s1278_s22 = scalar_select %p1052_p4, 1, 0 }
  0x11   : > { %s1279_s23 = scalar_select %p1057_p6, 1, 0 }
  0x12   : > { %p1062_p8 = pnand %p654_p5, %p144_p7  ;;  %s977_s25 = smov [#allocation8]  }
  0x13   : > { %s156_s26 = sshll.u32 %s977_s25, 4  ;;  %s36_s28 = sadd.s32 1, %s971_s16  ;;  %s157_s26 = int_to_ptr.vmem [resolvable:$true] %s156_s26 }
  0x14   : > { %s1280_s24 = scalar_select %p1062_p8, 1, 0 }
  0x15   : > { %p720_p9 = pneg %p1062_p8  ;;  %s799_s4 = scalar_lea.hbm %s1269_s1, 512 }
  0x16   : > { %p800_p12 = scmp.ne.s32.totalorder %s1269_s1, %s799_s4  ;;  %p806_p5 = scmp.lt.u32.totalorder %s799_s4, %s1269_s1 }
  0x17   : > { %p1071_p11 = pnand %p720_p9, %p1042_p1 }
  0x19   : > { %p801_p13 = pneg %p1071_p11 }
  0x1b   : > { %p802_p0 = pnand %p801_p13, %p800_p12 }
  0x1d   : > { %p803_p3 = pneg %p802_p0 }
  0x1f   : > { %p808_p7 = pnand %p806_p5, %p803_p3 }
  0x21   : > { %811 = shalt.err (!%p808_p7)
}
  0x22   : > { %s812_s9 = scalar_lea.vmem %s157_s26, 512  ;;  %p820_p1 = scmp.lt.s32.totalorder %s157_s26, %s157_s26 }
  0x23   : > { %p813_p9 = scmp.ne.s32.totalorder %s157_s26, %s812_s9  ;;  %p821_p4 = scmp.lt.s32.totalorder %s812_s9, %s812_s9 }
  0x25   : > { %p815_p10 = pnand %p813_p9, %p801_p13  ;;  %p822_p8 = por %p821_p4, %p820_p1 }
  0x27   : > { %p816_p6 = pneg %p815_p10 }
  0x29   : > { %p823_p2 = pnand %p822_p8, %p816_p6 }
  0x2b   : > { %826 = shalt.err (!%p823_p2)
}
  0x2c   : > { %s978_s10 = smov 128   ;;  %s979_s11 = smov 8  }
  0x2d   : > { %723 = dma.hbm_to_vmem [thread:$0]  (!%p1071_p11), %s1269_s1, 512, %s157_s26, [#allocation9], %s978_s10, %s978_s10, %s979_s11  }
  0x2e   : > { %p38_p1 = scmp.ge.s32.totalorder %s36_s28, 2  ;;  %s43_s25 = sadd.s32 1, %s963_s14 }
  0x2f   : > { %p50_p2 = scmp.ne.s32.totalorder %s963_s14, %s959_s13  ;;  %p51_p4 = scmp.eq.s32.totalorder %s975_s17, 0 }
  0x30   : > { %s1297_s28 = smov (%p38_p1, %s36_s28), 0  ;;  %p1283_p8 = scmp.ne.s32.totalorder %s1277_s21, 0 }
  0x31   : > { %p1098_p6 = por %p51_p4, %p50_p2  ;;  %s40_s27 = ssub.s32 %s971_s16, %s1297_s28 }
  0x32   : > { %p1104_p10 = por %p1283_p8, %p50_p2  ;;  %p736_p12 = scmp.lt.s32.totalorder %s975_s17, 2 }
  0x33   : > { %p41_p11 = scmp.eq.s32.totalorder %s40_s27, 0  ;;  %s170_s26 = sand.u32 1, %s963_s14  }
  0x34   : > { %s657_s4 = sshll.u32 %s170_s26, 3  ;;  %s658_s6 = sshll.u32 %s971_s16, 7 }
  0x35   : > { %s1113_s5 = scalar_select %p41_p11, %s963_s14, %s43_s25  }
  0x36   : > { %s1119_s9 = scalar_lea.hbm %s1268_s0, %s658_s6  ;;  %s174_s21 = scalar_lea.vmem [#allocation5], %s657_s4 }
  0x37   : > { %s181_s10 = sshll.u32 %s174_s21, 4  ;;  %p1125_p13 = pnand %p736_p12, %p1098_p6  ;;  %s1121_s10 = int_to_ptr.vmem [resolvable:$true] %s181_s10 }
  0x38   : > { %s171_s18 = scalar_lea.sflag [#allocation6], %s170_s26  ;;  %s827_s19 = scalar_lea.hbm %s1119_s9, 128 }
  0x39   : > { %p828_p0 = scmp.ne.s32.totalorder %s1119_s9, %s827_s19  ;;  %p829_p3 = pneg %p1125_p13 }
  0x3a   : > { %s832_s4 = scalar_lea.hbm %s1268_s0, 256  ;;  %p833_p9 = scmp.lt.u32.totalorder %s1119_s9, %s1268_s0 }
  0x3b   : > { %p830_p5 = pnand %p829_p3, %p828_p0  ;;  %p834_p1 = scmp.lt.u32.totalorder %s832_s4, %s827_s19 }
  0x3c   : > { %p836_p4 = scmp.lt.u32.totalorder %s827_s19, %s1119_s9 }
  0x3d   : > { %p831_p7 = pneg %p830_p5  ;;  %p835_p2 = por %p834_p1, %p833_p9 }
  0x3f   : > { %p837_p6 = por %p836_p4, %p835_p2 }
  0x41   : > { %p838_p8 = pnand %p837_p6, %p831_p7 }
  0x43   : > { %841 = shalt.err (!%p838_p8)
}
  0x44   : > { %s842_s26 = scalar_lea.vmem %s1121_s10, 128  ;;  %s980_s7 = smov [#allocation5]  }
  0x45   : > { %p843_p12 = scmp.ne.s32.totalorder %s1121_s10, %s842_s26  ;;  %s847_s8 = sshll.u32 %s980_s7, 4  ;;  %s848_s8 = int_to_ptr.vmem [resolvable:$false] %s847_s8 }
  0x46   : > { %s849_s21 = scalar_lea.vmem %s848_s8, 256  ;;  %p850_p5 = scmp.lt.s32.totalorder %s1121_s10, %s848_s8 }
  0x47   : > { %p845_p11 = pnand %p843_p12, %p829_p3  ;;  %p851_p9 = scmp.lt.s32.totalorder %s849_s21, %s842_s26 }
  0x49   : > { %p846_p0 = pneg %p845_p11  ;;  %p852_p1 = por %p851_p9, %p850_p5 }
  0x4b   : > { %p853_p2 = pnand %p852_p1, %p846_p0 }
  0x4d   : > { %856 = shalt.err (!%p853_p2)
}
  0x4e   : > { %727 = dma.hbm_to_vmem [thread:$0]  (!%p1125_p13), %s1119_s9, 128, %s1121_s10, %s171_s18  }
  0x4f   : > { %p1286_p7 = scmp.ne.s32.totalorder %s1280_s24, 0 }
  0x50   : > { %s1157_s19 = sand.u32 (!%p1286_p7), 1, %s959_s13   ;;  %p1287_p3 = scmp.ne.s32.totalorder (!%p1286_p7), %s1278_s22, 0 }
  0x51   : > { %190 = sbr.rel (%p1286_p7) target bundleno = 1199 (0x4af), region = 28  ;;  %s1160_s25 = sshll.u32 (!%p1286_p7), %s1157_s19, 3 }
  0x52   : > { %s193_s27 = scalar_lea.sflag (!%p1286_p7), [#allocation6], %s1157_s19  ;;  %s196_s4 = scalar_lea.vmem (!%p1286_p7), [#allocation5], %s1160_s25 }
  0x58   : > { %938 = dma.done.wait (%p1287_p3), %s193_s27, 128  }
  0x59   : > { %940 = vsyncadd (%p1287_p3), %s193_s27, 4294967168  ;;  %p1288_p13 = scmp.ne.s32.totalorder %s1276_s20, 0 }
  0x5b   : > { %942 = dma.done.wait (%p1288_p13), [#allocation9], 512  }
  0x5c   : > { %944 = vsyncadd (%p1288_p13), [#allocation9], 4294966784  ;;  %v981_v0 = vmov 0.0|0.0   ;;  %vm982_vm0 = vmmov 0   ;;  %v983_v1 = vmov 0.0   ;;  %v233_v2 = vld [vmem:[#allocation8] sm:$0xff] }
  0x5d   : > { %704 = vmatprep.subr.bf16.mxu0 %v981_v0  ;;  %691 = vmatprep.mubr.msk.f32.mxu0 %vm982_vm0, %v983_v1  ;;  %v234_v3 = vld [vmem:[#allocation8 + $0x8] sm:$0xff]  ;;  %v235_v4 = vld [vmem:[#allocation8 + $0x10] sm:$0xff]  ;;  %v236_v6 = vld [vmem:[#allocation8 + $0x18] sm:$0xff]  ;;  %vm237_vm1 = vcmask 261120   ;;  %s984_s20 = smov 96   ;;  %vm404_vm2 = vcmask 64512  }
  0x5e   : > { %694 = vmatprep.subr.mxu1 %v983_v1  ;;  %696 = vmatprep.mubr.msk.f32.mxu1 %vm982_vm0, %v983_v1  ;;  %v705_v5 = vpack.c.bf16 %v234_v3, %v233_v2  ;;  %v708_v7 = vpack.c.bf16 %v236_v6, %v235_v4  ;;  %v232_v8 = vld [vmem:[%s196_s4] sm:$0xff]  ;;  %s985_s22 = smov 64   ;;  %s227_s24 = scalar_lea.vmem [#allocation11], %s1160_s25 }
  0x5f   : > { %s670_s9 = sshll.u32 %s967_s15, 7  ;;  %s528_s29 = sshll.u32 %s227_s24, 4  ;;  %s529_s29 = int_to_ptr.vmem [resolvable:$true] %s528_s29 }
  0x60   : > { %706 = vmatpush3.bf16.msra.mxu0 %v705_v5  ;;  %s1192_s18 = scalar_lea.hbm %s1271_s3, %s670_s9  ;;  %s500_s6 = scalar_lea.sflag [#allocation12], %s1157_s19 }
  0x61   : > { %707 = vmatprep.subr.bf16.mxu0 %v981_v0  ;;  %s857_s26 = scalar_lea.vmem %s529_s29, 128  ;;  %s986_s7 = smov [#allocation11]  }
  0x62   : > { %p858_p4 = scmp.ne.s32.totalorder %s529_s29, %s857_s26  ;;  %s861_s8 = sshll.u32 %s986_s7, 4  ;;  %s862_s8 = int_to_ptr.vmem [resolvable:$false] %s861_s8 }
  0x63   : > { %s863_s21 = scalar_lea.vmem %s862_s8, 256  ;;  %p864_p12 = scmp.lt.s32.totalorder %s529_s29, %s862_s8 }
  0x64   : > { %709 = vmatpush3.bf16.msra.mxu0 %v708_v7  ;;  %p859_p6 = pnand %p858_p4, %p1104_p10  ;;  %p865_p11 = scmp.lt.s32.totalorder %s863_s21, %s857_s26 }
  0x66   : > { %p860_p8 = pneg %p859_p6  ;;  %p866_p0 = por %p865_p11, %p864_p12 }
  0x67   : > { %692 = vmatmul.mubr.msk.f32.vlgmr.msra.gmra.mrb[0].mxu0 %vm237_vm1, %v232_v8 }
  0x68   : > { %p867_p5 = pnand %p866_p0, %p860_p8 }
 0x13a   : > { %v307_v9 = vpop.f32.mrb[0].mxu0 }
 0x13b   : > { %v311_v10 = vmul.f32 0.17677669, %v307_v9  ;;  %314 = vrot.lane.b32.xlu0 %v307_v9, %s984_s20  ;;  %v693_v11 = vpop.f32.mrb[1].mxu0 }
 0x13d   : > { %312 = vst.msk [vmem:[#allocation2] sm:$0xff] %vm237_vm1, %v311_v10 }
 0x144   : > { %v324_v14 = vld [vmem:[#allocation2] sm:$0xff] }
 0x1ad   : > { %v315_v12 = vpop.permute.xlu0 %314 }
 0x1ae   : > { %317 = vst.msk [vmem:[#allocation3] sm:$0xff] %vm237_vm1, %v315_v12 }
 0x1b5   : > { %v325_v13 = vld [vmem:[#allocation3] sm:$0xff] }
 0x1b6   : > { %695 = vmatpush3.xpose.msk.msra.mxu1 %vm237_vm1, %v325_v13 }
 0x1b7   : > { %699 = vmatprep.subr.mxu1 %v983_v1 }
 0x1b9   : > { %697 = vmatmul.mubr.msk.f32.vlgmr.msra.gmra.mrb[0].mxu1 %vm237_vm1, %v324_v14 }
 0x1ba   : > { %701 = vmatprep.mubr.msk.f32.mxu1 %vm982_vm0, %v983_v1 }
 0x28c   : > { %v400_v15 = vpop.f32.mrb[0].mxu1 }
 0x28d   : > { %v698_v16 = vpop.f32.mrb[1].mxu1  ;;  %v405_v17 = vsel %vm404_vm2, %v400_v15, -inf }
 0x28e   : > { %406 = vmax.xlane.f32.xlu0 %v405_v17 }
 0x31b   : > { %v407_v18 = vpop.xlane.xlu0 %406 }
 0x31c   : > { %v408_v19 = vsub.f32 %v400_v15, %v407_v18 }
 0x31e   : > { %v409_v20 = vmul.f32 1.442695, %v408_v19 }
 0x320   : > { %795 = vpow2.f32 %v409_v20 }
 0x32a   : > { %v796_v21 = vpop.eup %795 }
 0x32b   : > { %v411_v22 = vsel %vm404_vm2, %v796_v21, 0.0 }
 0x32c   : > { %412 = vadd.xlane.f32.xlu1 %v411_v22 }
 0x33d   : > { %318 = vrot.lane.b32.xlu1 %v307_v9, %s985_s22 }
 0x3b9   : > { %v413_v23 = vpop.xlane.xlu1 %412 }
 0x3ba   : > { %797 = vrcp.f32 %v413_v23 }
 0x3bd   : > { %v319_v24 = vpop.permute.xlu1 %318 }
 0x3be   : > { %321 = vst.msk [vmem:[#allocation4] sm:$0xff] %vm237_vm1, %v319_v24 }
 0x3c4   : > { %v798_v25 = vpop.eup %797 }
 0x3c5   : > { %v415_v26 = vmul.f32 %v798_v25, %v413_v23  ;;  %v326_v27 = vld [vmem:[#allocation4] sm:$0xff] }
 0x3c6   : > { %700 = vmatpush3.msra.mxu1 %v326_v27 }
 0x3c7   : > { %v416_v28 = vsub.f32 2.0, %v415_v26 }
 0x3c9   : > { %v417_v29 = vmul.f32 %v798_v25, %v416_v28 }
 0x3cb   : > { %v418_v30 = vmul.f32 %v796_v21, %v417_v29 }
 0x3cd   : > { %702 = vmatmul.mubr.msk.f32.vlgmr.msra.gmra.mrb[2].mxu1 %vm404_vm2, %v418_v30  ;;  %493 = vst.msk [vmem:[%s227_s24] sm:$0xff] %vm404_vm2, %v418_v30 }
 0x3ce   : > { %870 = shalt.err (!%p867_p5)
}
 0x3cf   : > { %s871_s27 = scalar_lea.hbm %s1192_s18, 128  ;;  %s875_s22 = scalar_lea.hbm %s1271_s3, 256 }
 0x3d0   : > { %p872_p9 = scmp.ne.s32.totalorder %s1192_s18, %s871_s27  ;;  %p876_p7 = scmp.lt.u32.totalorder %s1192_s18, %s1271_s3 }
 0x3d1   : > { %p877_p3 = scmp.lt.u32.totalorder %s875_s22, %s871_s27  ;;  %p879_p4 = scmp.lt.u32.totalorder %s871_s27, %s1192_s18 }
 0x3d2   : > { %p873_p1 = pnand %p872_p9, %p1104_p10 }
 0x3d3   : > { %p878_p13 = por %p877_p3, %p876_p7 }
 0x3d4   : > { %p874_p2 = pneg %p873_p1 }
 0x3d5   : > { %p880_p6 = por %p879_p4, %p878_p13 }
 0x3d7   : > { %p881_p8 = pnand %p880_p6, %p874_p2 }
 0x3d9   : > { %884 = shalt.err (!%p881_p8)
}
 0x3da   : > { %717 = dma.vmem_to_hbm [thread:$0]  (%p1104_p10), %s529_s29, 128, %s1192_s18, %s500_s6  }
 0x3db   : > { %s220_s11 = scalar_lea.vmem [#allocation10], %s1160_s25  ;;  %s1218_s21 = scalar_lea.hbm %s1270_s2, %s670_s9 }
 0x3dc   : > { %s514_s26 = sshll.u32 %s220_s11, 4  ;;  %s495_s27 = scalar_lea.sflag [#allocation7], %s1157_s19  ;;  %s1220_s26 = int_to_ptr.vmem [resolvable:$true] %s514_s26 }
 0x3dd   : > { %s885_s4 = scalar_lea.vmem %s1220_s26, 128  ;;  %s987_s15 = smov [#allocation10]  }
 0x3de   : > { %p886_p12 = scmp.ne.s32.totalorder %s1220_s26, %s885_s4  ;;  %s889_s25 = sshll.u32 %s987_s15, 4  ;;  %s890_s25 = int_to_ptr.vmem [resolvable:$false] %s889_s25 }
 0x3df   : > { %s891_s9 = scalar_lea.vmem %s890_s25, 256  ;;  %p892_p5 = scmp.lt.s32.totalorder %s1220_s26, %s890_s25 }
 0x3e0   : > { %p887_p11 = pnand %p886_p12, %p1104_p10  ;;  %p893_p9 = scmp.lt.s32.totalorder %s891_s9, %s885_s4 }
 0x3e2   : > { %p888_p0 = pneg %p887_p11  ;;  %p894_p1 = por %p893_p9, %p892_p5 }
 0x3e4   : > { %p895_p2 = pnand %p894_p1, %p888_p0 }
 0x4a0   : > { %v488_v31 = vpop.f32.mrb[2].mxu1 }
 0x4a1   : > { %492 = vst.msk [vmem:[%s220_s11] sm:$0xff] %vm237_vm1, %v488_v31  ;;  %v703_v32 = vpop.f32.mrb[3].mxu1 }
 0x4a2   : > { %898 = shalt.err (!%p895_p2)
}
 0x4a3   : > { %s899_s19 = scalar_lea.hbm %s1218_s21, 128  ;;  %s903_s6 = scalar_lea.hbm %s1270_s2, 256 }
 0x4a4   : > { %p900_p7 = scmp.ne.s32.totalorder %s1218_s21, %s899_s19  ;;  %p904_p4 = scmp.lt.u32.totalorder %s1218_s21, %s1270_s2 }
 0x4a5   : > { %p905_p6 = scmp.lt.u32.totalorder %s903_s6, %s899_s19  ;;  %p907_p12 = scmp.lt.u32.totalorder %s899_s19, %s1218_s21 }
 0x4a6   : > { %p901_p3 = pnand %p900_p7, %p1104_p10 }
 0x4a7   : > { %p906_p8 = por %p905_p6, %p904_p4 }
 0x4a8   : > { %p902_p13 = pneg %p901_p3 }
 0x4a9   : > { %p908_p11 = por %p907_p12, %p906_p8 }
 0x4ab   : > { %p909_p0 = pnand %p908_p11, %p902_p13 }
 0x4ad   : > { %912 = shalt.err (!%p909_p0)
}
 0x4ae   : > { %716 = dma.vmem_to_hbm [thread:$0]  (%p1104_p10), %s1220_s26, 128, %s1218_s21, %s495_s27  }
 0x4af PF: > { %s540_s24 = sand.u32 1, %s955_s12   ;;  %p1289_p5 = scmp.ne.s32.totalorder %s1279_s23, 0 }
 0x4b0   : > { %p1290_p9 = scmp.ge.s32.totalorder %s975_s17, 2  ;;  %s541_s10 = scalar_lea.sflag [#allocation7], %s540_s24 }
 0x4b2   : > { %p729_p1 = pnand %p1290_p9, %p1289_p5 }
 0x4b4   : > { %946 = dma.done.wait (!%p729_p1), %s541_s10, 128  }
 0x4b5   : > { %948 = vsyncadd (!%p729_p1), %s541_s10, 4294967168  ;;  %s550_s11 = scalar_lea.sflag [#allocation12], %s540_s24 }
 0x4b6   : > { %950 = dma.done.wait (!%p729_p1), %s550_s11, 128  }
 0x4b7   : > { %952 = vsyncadd (!%p729_p1), %s550_s11, 4294967168  ;;  %s24_s17 = sadd.s32 1, %s975_s17   ;;  %s1291_s12 = smov %s959_s13 }
 0x4b8   : > { %p21_p2 = scmp.ge.s32.totalorder %s24_s17, 4   ;;  %s1292_s13 = smov %s963_s14 }
 0x4b9   : > { %s1293_s14 = smov %s1113_s5  ;;  %s1294_s15 = smov %s971_s16 }
 0x4ba   : > { %s1295_s16 = smov %s1297_s28  ;;  %23 = sbr.rel (!%p21_p2) target bundleno = 9 (0x9), region = 99 }
 0x4c1   :  { %555 = vsyncpa [#allocation6], 1 }
 0x4c2   :  { %557 = vsyncpa [#allocation6 + $0x1], 1 }
 0x4c3   :  { %558 = vsyncpa [#allocation9], 1 }
 0x4c4   :  { %559 = vsyncpa [#allocation7], 1 }
 0x4c5   :  { %561 = vsyncpa [#allocation7 + $0x1], 1 }
 0x4c6   :  { %562 = vsyncpa [#allocation12], 1 }
 0x4c7   :  { %564 = vsyncpa [#allocation12 + $0x1], 1 }

</bundles_post_ra>
